<compile_context>
chip_gen: v7x
topology: tpu7x:2x2x1
jax: 0.10.0
libtpu: 0.0.40
codegen_flags: <defaults>
</compile_context>

<pallas_src>
import functools

import jax
import jax.numpy as jnp
from jax.experimental import pallas as pl
from jax.experimental.pallas import tpu as pltpu


LANE = 128           # lane width (last-dim alignment)
BF16_SUBLANE = 16    # bf16 sublane quantum (second-to-last-dim alignment)


def _round_up(x, m):
    return (x + m - 1) // m * m


def _vmem_capacity_bytes():
    """Best-effort per-core VMEM capacity; conservative (v7x = 64 MiB) fallback."""
    try:
        info = pltpu.get_tpu_info()
        cap = getattr(info, "vmem_capacity_bytes", None)
        if cap:
            return int(cap)
    except Exception:
        pass
    return 64 * 1024 * 1024


# ---------------------------------------------------------------------------
# Fused kernel: one batch tile of the full 3-layer MLP.
# ---------------------------------------------------------------------------
def mlp_kernel(x_ref, w1_ref, b1_ref, w2_ref, b2_ref, w3_ref, b3_ref, o_ref):
    # x arrives in its original dtype (f32); cast to bf16 in-kernel so the
    # wrapper never needs an extra HBM pad/cast pass over x.
    x = x_ref[...].astype(w1_ref.dtype)

    # Layer 1: x @ W1 + b1, ReLU (bf16 operands, f32 accumulation on the MXU)
    h = jnp.dot(x, w1_ref[...], preferred_element_type=jnp.float32)
    h = jnp.maximum(h + b1_ref[...], 0.0)

    # Layer 2: h @ W2 + b2, ReLU
    h = jnp.dot(h.astype(w2_ref.dtype), w2_ref[...],
                preferred_element_type=jnp.float32)
    h = jnp.maximum(h + b2_ref[...], 0.0)

    # Layer 3: h @ W3 + b3 (logits) — lane-dense (padded) store
    out = jnp.dot(h.astype(w3_ref.dtype), w3_ref[...],
                  preferred_element_type=jnp.float32)
    o_ref[...] = (out + b3_ref[...]).astype(o_ref.dtype)


def _fused_vmem_bytes(tile_b, in_p, hid_p, out_p):
    """Rough per-call VMEM footprint of the fused kernel."""
    w = 2 * (in_p * hid_p + hid_p * hid_p + hid_p * out_p)   # bf16 weights, 1-buffered
    b = 4 * 8 * (2 * hid_p + out_p)                          # f32 biases, 8-sublane pad
    x = 2 * tile_b * in_p * 4                                # f32 x tile, double-buffered
    o = 2 * tile_b * out_p * 4                               # f32 out tile, double-buffered
    h = 3 * tile_b * hid_p * 4                               # live intermediates (rough)
    return w + b + x + o + h


def _choose_tile_b(B, in_p, hid_p, out_p, budget):
    if B <= 128:
        return _round_up(max(B, 1), BF16_SUBLANE)

    def fits(t):
        return _fused_vmem_bytes(t, in_p, hid_p, out_p) <= budget

    # Prefer >= 2 grid steps so v7x's 2 TensorCores can split the batch axis.
    for t in (512, 256, 128):
        if fits(t) and -(-B // t) >= 2:
            return t
    for t in (512, 256, 128):
        if fits(t):
            return t
    return 128


def _fused_forward(x, w1, b1, w2, b2, w3, b3, *, cap):
    B, in_f = x.shape
    IN_P, HID_P = w1.shape
    OUT_P = w3.shape[1]

    TILE_B = _choose_tile_b(B, IN_P, HID_P, OUT_P, budget=int(cap * 0.85))
    B_pad = _round_up(B, TILE_B)

    # Only touch x if padding is actually required (no wrapper-side cast pass).
    if (B_pad != B) or (IN_P != in_f):
        x_p = jnp.pad(x, ((0, B_pad - B), (0, IN_P - in_f)))
    else:
        x_p = x

    grid = (B_pad // TILE_B,)

    est = _fused_vmem_bytes(TILE_B, IN_P, HID_P, OUT_P)
    vmem_limit = int(min(cap * 0.9, est + est // 4 + (4 << 20)))
    vmem_limit = max(vmem_limit, 16 << 20)

    flops = 2 * B_pad * (IN_P * HID_P + HID_P * HID_P + HID_P * OUT_P)
    bytes_accessed = (
        x_p.size * x_p.dtype.itemsize
        + sum(a.size * a.dtype.itemsize for a in (w1, b1, w2, b2, w3, b3))
        + B_pad * OUT_P * 4
    )

    # Constant-index weight/bias blocks: single-buffer them (no overlap benefit
    # from double-buffering a block that never changes).
    resident = functools.partial(pl.BlockSpec, pipeline_mode=pl.Buffered(1))

    out_padded = pl.pallas_call(
        mlp_kernel,
        out_shape=jax.ShapeDtypeStruct((B_pad, OUT_P), jnp.float32),
        grid=grid,
        in_specs=[
            pl.BlockSpec((TILE_B, IN_P), lambda i: (i, 0)),   # x: tiled over batch
            resident((IN_P, HID_P), lambda i: (0, 0)),        # W1: VMEM-resident
            resident((1, HID_P), lambda i: (0, 0)),           # b1
            resident((HID_P, HID_P), lambda i: (0, 0)),       # W2
            resident((1, HID_P), lambda i: (0, 0)),           # b2
            resident((HID_P, OUT_P), lambda i: (0, 0)),       # W3
            resident((1, OUT_P), lambda i: (0, 0)),           # b3
        ],
        out_specs=pl.BlockSpec((TILE_B, OUT_P), lambda i: (i, 0)),
        compiler_params=pltpu.CompilerParams(
            dimension_semantics=("parallel",),
            vmem_limit_bytes=vmem_limit,
        ),
        cost_estimate=pl.CostEstimate(
            flops=flops, transcendentals=0, bytes_accessed=bytes_accessed
        ),
    )(x_p, w1, b1, w2, b2, w3, b3)

    return out_padded, B


# ---------------------------------------------------------------------------
# Fallback path (v7x-safe when weights don't fit VMEM): per-layer tiled matmul.
# ---------------------------------------------------------------------------
def _pick_feature_tile(dim, prefs=(512, 256, 128)):
    for t in prefs:
        if dim % t == 0:
            return t
    return dim  # dims are padded to >=128-lane multiples, so this is rare


def _make_linear_kernel(apply_relu):
    def kernel(x_ref, w_ref, b_ref, o_ref, acc_ref):
        @pl.when(pl.program_id(2) == 0)
        def _():
            acc_ref[...] = jnp.zeros_like(acc_ref)

        acc_ref[...] += jnp.dot(x_ref[...].astype(w_ref.dtype), w_ref[...],
                                preferred_element_type=jnp.float32)

        @pl.when(pl.program_id(2) == pl.num_programs(2) - 1)
        def _():
            r = acc_ref[...] + b_ref[...]
            if apply_relu:
                r = jnp.maximum(r, 0.0)
            o_ref[...] = r.astype(o_ref.dtype)

    return kernel


def _linear_layer(x, w, b, *, apply_relu, out_dtype, tm, cap):
    M, K = x.shape
    _, N = w.shape
    tn = _pick_feature_tile(N)
    tk = _pick_feature_tile(K)
    grid = (M // tm, N // tn, K // tk)

    est = (2 * tm * tk * x.dtype.itemsize            # x tile, double-buffered
           + 2 * tk * tn * 2                         # bf16 W tile, double-buffered
           + 2 * 8 * tn * 4                          # bias tile
           + 2 * tm * tn * jnp.dtype(out_dtype).itemsize
           + tm * tn * 4)                            # f32 accumulator scratch
    vmem_limit = int(min(cap * 0.9, max(est + est // 4 + (4 << 20), 16 << 20)))

    return pl.pallas_call(
        _make_linear_kernel(apply_relu),
        out_shape=jax.ShapeDtypeStruct((M, N), out_dtype),
        grid=grid,
        in_specs=[
            pl.BlockSpec((tm, tk), lambda i, j, k: (i, k)),
            pl.BlockSpec((tk, tn), lambda i, j, k: (k, j)),
            pl.BlockSpec((1, tn), lambda i, j, k: (0, j)),
        ],
        out_specs=pl.BlockSpec((tm, tn), lambda i, j, k: (i, j)),
        scratch_shapes=[pltpu.VMEM((tm, tn), jnp.float32)],
        compiler_params=pltpu.CompilerParams(
            dimension_semantics=("parallel", "parallel", "arbitrary"),
            vmem_limit_bytes=vmem_limit,
        ),
    )(x, w, b)


def _layered_forward(x, w1, b1, w2, b2, w3, b3, *, cap):
    B, in_f = x.shape
    IN_P = w1.shape[0]

    TILE_B = 256 if B > 256 else _round_up(max(B, 1), BF16_SUBLANE)
    B_pad = _round_up(B, TILE_B)

    if (B_pad != B) or (IN_P != in_f):
        x_p = jnp.pad(x, ((0, B_pad - B), (0, IN_P - in_f)))
    else:
        x_p = x

    h = _linear_layer(x_p, w1, b1, apply_relu=True, out_dtype=jnp.bfloat16,
                      tm=TILE_B, cap=cap)
    h = _linear_layer(h, w2, b2, apply_relu=True, out_dtype=jnp.bfloat16,
                      tm=TILE_B, cap=cap)
    out = _linear_layer(h, w3, b3, apply_relu=False, out_dtype=jnp.float32,
                        tm=TILE_B, cap=cap)
    return out, B


# ---------------------------------------------------------------------------
# Top-level forward.
# ---------------------------------------------------------------------------
@functools.partial(jax.jit, static_argnames=("num_classes", "force_layered"))
def _forward_impl(x, w1, b1, w2, b2, w3, b3, *, num_classes, force_layered=False):
    IN_P, HID_P = w1.shape
    OUT_P = w3.shape[1]
    cap = _vmem_capacity_bytes()

    # If bf16 weights exceed ~60% of per-core VMEM (v7x: 64 MiB), the fully
    # weight-resident fused scheme can't fit — fall back to per-layer kernels.
    weight_bytes = 2 * (IN_P * HID_P + HID_P * HID_P + HID_P * OUT_P)
    use_layered = force_layered or weight_bytes > int(0.6 * cap)

    if use_layered:
        out_padded, B = _layered_forward(x, w1, b1, w2, b2, w3, b3, cap=cap)
    else:
        out_padded, B = _fused_forward(x, w1, b1, w2, b2, w3, b3, cap=cap)

    # Drop padded batch rows / padded logit columns.
    return out_padded[:B, :num_classes]


def neural_net_forward(x, prepared, force_layered=False):
    """x: (B, input_size) f32. prepared: output of prepare_params()."""
    return _forward_impl(
        x,
        prepared["w1"], prepared["b1"],
        prepared["w2"], prepared["b2"],
        prepared["w3"], prepared["b3"],
        num_classes=prepared["num_classes"],
        force_layered=force_layered,
    )


# ---------------------------------------------------------------------------
# Parameter init (mimics nn.Linear) and one-time padding / dtype prep.
# ---------------------------------------------------------------------------
def init_params(key, input_size, hidden_size, num_classes):
    """Deterministic init mimicking nn.Linear's uniform(-1/sqrt(fan_in), ...)."""
    ks = jax.random.split(key, 6)

    def linear(kw, kb, fan_in, fan_out):
        bound = 1.0 / jnp.sqrt(jnp.float32(fan_in))
        # stored as (in_features, out_features) so the kernel computes x @ W
        w = jax.random.uniform(kw, (fan_in, fan_out), jnp.float32, -bound, bound)
        b = jax.random.uniform(kb, (1, fan_out), jnp.float32, -bound, bound)
        return w, b

    w1, b1 = linear(ks[0], ks[1], input_size, hidden_size)
    w2, b2 = linear(ks[2], ks[3], hidden_size, hidden_size)
    w3, b3 = linear(ks[4], ks[5], hidden_size, num_classes)
    return {"w1": w1, "b1": b1, "w2": w2, "b2": b2, "w3": w3, "b3": b3,
            "input_size": input_size, "hidden_size": hidden_size,
            "num_classes": num_classes}


def prepare_params(p):
    """Zero-pad feature dims to 128-lane multiples, cast weights to bf16.

    Done once, off the hot path. Zero-padding preserves the math exactly.
    """
    in_f, hid, ncls = p["input_size"], p["hidden_size"], p["num_classes"]
    IN_P = _round_up(in_f, LANE)
    HID_P = _round_up(hid, LANE)
    OUT_P = _round_up(ncls, LANE)

    def pad_w(w, rows, cols):
        return jnp.pad(w, ((0, rows - w.shape[0]), (0, cols - w.shape[1])))

    def pad_b(b, cols):
        return jnp.pad(b, ((0, 0), (0, cols - b.shape[1])))

    return {
        "w1": pad_w(p["w1"], IN_P, HID_P).astype(jnp.bfloat16),
        "b1": pad_b(p["b1"], HID_P),                      # f32, lane-dense
        "w2": pad_w(p["w2"], HID_P, HID_P).astype(jnp.bfloat16),
        "b2": pad_b(p["b2"], HID_P),
        "w3": pad_w(p["w3"], HID_P, OUT_P).astype(jnp.bfloat16),
        "b3": pad_b(p["b3"], OUT_P),
        "num_classes": ncls,
    }


def reference_forward(x, p):
    h = jnp.maximum(x @ p["w1"] + p["b1"], 0.0)
    h = jnp.maximum(h @ p["w2"] + p["b2"], 0.0)
    return h @ p["w3"] + p["b3"]


if __name__ == "__main__":
    batch, input_size, hidden_size, num_classes = 8, 32, 32, 10

    key = jax.random.PRNGKey(0)
    k_x, k_p = jax.random.split(key)
    x = jax.random.normal(k_x, (batch, input_size), jnp.float32)

    raw_params = init_params(k_p, input_size, hidden_size, num_classes)
    prepared = prepare_params(raw_params)

    ref = reference_forward(x, raw_params)

    # Fused (weight-resident) path.
    out = jax.block_until_ready(neural_net_forward(x, prepared))
    assert out.shape == (batch, num_classes)
    # bf16 matmul operands with f32 accumulation -> small numeric delta vs f32.
    assert jnp.allclose(out, ref, atol=5e-2, rtol=5e-2), (
        f"fused: max abs err {jnp.max(jnp.abs(out - ref))}"
    )

    # Per-layer fallback path (used for very large hidden sizes on v7x);
    # exercised here to keep it compile-tested and verified.
    out_l = jax.block_until_ready(neural_net_forward(x, prepared, force_layered=True))
    assert out_l.shape == (batch, num_classes)
    assert jnp.allclose(out_l, ref, atol=5e-2, rtol=5e-2), (
        f"layered: max abs err {jnp.max(jnp.abs(out_l - ref))}"
    )

    print("KERNEL_OK")
</pallas_src>

<mosaic_0001>
module attributes {stable_mosaic.version = 11 : i64} {
  func.func @mlp_kernel(%arg0: i32, %arg1: memref<16x128xf32, #tpu.memory_space<vmem>>, %arg2: memref<128x128xbf16, #tpu.memory_space<vmem>>, %arg3: memref<1x128xf32, #tpu.memory_space<vmem>>, %arg4: memref<128x128xbf16, #tpu.memory_space<vmem>>, %arg5: memref<1x128xf32, #tpu.memory_space<vmem>>, %arg6: memref<128x128xbf16, #tpu.memory_space<vmem>>, %arg7: memref<1x128xf32, #tpu.memory_space<vmem>>, %arg8: memref<16x128xf32, #tpu.memory_space<vmem>>) attributes {dimension_semantics = [#tpu.dimension_semantics<parallel>], iteration_bounds = array<i64: 1>, scalar_prefetch = 0 : i64, scratch_operands = 0 : i64, tpu.core_type = #tpu.core_type<tc>, window_params = [{transform_indices = @transform_0, window_bounds = array<i64: 16, 128>}, {pipeline_mode = #tpu.pipeline_mode<synchronous>, transform_indices = @transform_1, window_bounds = array<i64: 128, 128>}, {pipeline_mode = #tpu.pipeline_mode<synchronous>, transform_indices = @transform_2, window_bounds = array<i64: 1, 128>}, {pipeline_mode = #tpu.pipeline_mode<synchronous>, transform_indices = @transform_3, window_bounds = array<i64: 128, 128>}, {pipeline_mode = #tpu.pipeline_mode<synchronous>, transform_indices = @transform_4, window_bounds = array<i64: 1, 128>}, {pipeline_mode = #tpu.pipeline_mode<synchronous>, transform_indices = @transform_5, window_bounds = array<i64: 128, 128>}, {pipeline_mode = #tpu.pipeline_mode<synchronous>, transform_indices = @transform_6, window_bounds = array<i64: 1, 128>}, {transform_indices = @transform_7, window_bounds = array<i64: 16, 128>}]} {
    %c0 = arith.constant 0 : index
    %c0_0 = arith.constant 0 : index
    %0 = vector.load %arg1[%c0, %c0_0] : memref<16x128xf32, #tpu.memory_space<vmem>>, vector<16x128xf32>
    %1 = arith.truncf %0 : vector<16x128xf32> to vector<16x128xbf16>
    %c0_1 = arith.constant 0 : index
    %c0_2 = arith.constant 0 : index
    %2 = vector.load %arg2[%c0_1, %c0_2] : memref<128x128xbf16, #tpu.memory_space<vmem>>, vector<128x128xbf16>
    %cst = arith.constant dense<0.000000e+00> : vector<16x128xf32>
    %3 = tpu.matmul %1, %2, %cst {dimension_numbers = #tpu.dot_dimension_numbers<[1], [0], [0], [1], [0, 0, 1, 1], [], []>} : vector<16x128xbf16>, vector<128x128xbf16>, vector<16x128xf32> -> vector<16x128xf32>
    %c0_3 = arith.constant 0 : index
    %c0_4 = arith.constant 0 : index
    %4 = vector.load %arg3[%c0_3, %c0_4] : memref<1x128xf32, #tpu.memory_space<vmem>>, vector<1x128xf32>
    %5 = vector.broadcast %4 : vector<1x128xf32> to vector<16x128xf32>
    %6 = arith.addf %3, %5 : vector<16x128xf32>
    %cst_5 = arith.constant 0.000000e+00 : f32
    %7 = vector.broadcast %cst_5 : f32 to vector<16x128xf32>
    %8 = arith.maximumf %6, %7 : vector<16x128xf32>
    %9 = arith.truncf %8 : vector<16x128xf32> to vector<16x128xbf16>
    %c0_6 = arith.constant 0 : index
    %c0_7 = arith.constant 0 : index
    %10 = vector.load %arg4[%c0_6, %c0_7] : memref<128x128xbf16, #tpu.memory_space<vmem>>, vector<128x128xbf16>
    %cst_8 = arith.constant dense<0.000000e+00> : vector<16x128xf32>
    %11 = tpu.matmul %9, %10, %cst_8 {dimension_numbers = #tpu.dot_dimension_numbers<[1], [0], [0], [1], [0, 0, 1, 1], [], []>} : vector<16x128xbf16>, vector<128x128xbf16>, vector<16x128xf32> -> vector<16x128xf32>
    %c0_9 = arith.constant 0 : index
    %c0_10 = arith.constant 0 : index
    %12 = vector.load %arg5[%c0_9, %c0_10] : memref<1x128xf32, #tpu.memory_space<vmem>>, vector<1x128xf32>
    %13 = vector.broadcast %12 : vector<1x128xf32> to vector<16x128xf32>
    %14 = arith.addf %11, %13 : vector<16x128xf32>
    %cst_11 = arith.constant 0.000000e+00 : f32
    %15 = vector.broadcast %cst_11 : f32 to vector<16x128xf32>
    %16 = arith.maximumf %14, %15 : vector<16x128xf32>
    %17 = arith.truncf %16 : vector<16x128xf32> to vector<16x128xbf16>
    %c0_12 = arith.constant 0 : index
    %c0_13 = arith.constant 0 : index
    %18 = vector.load %arg6[%c0_12, %c0_13] : memref<128x128xbf16, #tpu.memory_space<vmem>>, vector<128x128xbf16>
    %cst_14 = arith.constant dense<0.000000e+00> : vector<16x128xf32>
    %19 = tpu.matmul %17, %18, %cst_14 {dimension_numbers = #tpu.dot_dimension_numbers<[1], [0], [0], [1], [0, 0, 1, 1], [], []>} : vector<16x128xbf16>, vector<128x128xbf16>, vector<16x128xf32> -> vector<16x128xf32>
    %c0_15 = arith.constant 0 : index
    %c0_16 = arith.constant 0 : index
    %20 = vector.load %arg7[%c0_15, %c0_16] : memref<1x128xf32, #tpu.memory_space<vmem>>, vector<1x128xf32>
    %21 = vector.broadcast %20 : vector<1x128xf32> to vector<16x128xf32>
    %22 = arith.addf %19, %21 : vector<16x128xf32>
    %c0_17 = arith.constant 0 : index
    %c0_18 = arith.constant 0 : index
    %23 = vector.load %arg8[%c0_17, %c0_18] : memref<16x128xf32, #tpu.memory_space<vmem>>, vector<16x128xf32>
    tpu.vector_store %arg8[%c0_17, %c0_18], %22 {strides = array<i32>} : memref<16x128xf32, #tpu.memory_space<vmem>>, vector<16x128xf32>,
    return
  }
  func.func @transform_0(%arg0: i32) -> (i32, i32) {
    %c0_i32 = arith.constant 0 : i32
    %c0_i32_0 = arith.constant 0 : i32
    return %arg0, %c0_i32 : i32, i32
  }
  func.func @transform_1(%arg0: i32) -> (i32, i32) {
    %c0_i32 = arith.constant 0 : i32
    %c0_i32_0 = arith.constant 0 : i32
    %c0_i32_1 = arith.constant 0 : i32
    return %c0_i32, %c0_i32_0 : i32, i32
  }
  func.func @transform_2(%arg0: i32) -> (i32, i32) {
    %c0_i32 = arith.constant 0 : i32
    %c0_i32_0 = arith.constant 0 : i32
    %c0_i32_1 = arith.constant 0 : i32
    return %c0_i32, %c0_i32_0 : i32, i32
  }
  func.func @transform_3(%arg0: i32) -> (i32, i32) {
    %c0_i32 = arith.constant 0 : i32
    %c0_i32_0 = arith.constant 0 : i32
    %c0_i32_1 = arith.constant 0 : i32
    return %c0_i32, %c0_i32_0 : i32, i32
  }
  func.func @transform_4(%arg0: i32) -> (i32, i32) {
    %c0_i32 = arith.constant 0 : i32
    %c0_i32_0 = arith.constant 0 : i32
    %c0_i32_1 = arith.constant 0 : i32
    return %c0_i32, %c0_i32_0 : i32, i32
  }
  func.func @transform_5(%arg0: i32) -> (i32, i32) {
    %c0_i32 = arith.constant 0 : i32
    %c0_i32_0 = arith.constant 0 : i32
    %c0_i32_1 = arith.constant 0 : i32
    return %c0_i32, %c0_i32_0 : i32, i32
  }
  func.func @transform_6(%arg0: i32) -> (i32, i32) {
    %c0_i32 = arith.constant 0 : i32
    %c0_i32_0 = arith.constant 0 : i32
    %c0_i32_1 = arith.constant 0 : i32
    return %c0_i32, %c0_i32_0 : i32, i32
  }
  func.func @transform_7(%arg0: i32) -> (i32, i32) {
    %c0_i32 = arith.constant 0 : i32
    %c0_i32_0 = arith.constant 0 : i32
    return %arg0, %c0_i32 : i32, i32
  }
}

</mosaic_0001>

<bundles_post_ra>
// kernel: _forward_impl.1
= control target key start
LH: loop header
LB: loop body
LE: loop exit
PB: predicated region body
PF: predicated region fallthrough
CT: control target
= control target key end

     0   :  { %12 = vsyncpa [#allocation3], 0  ;;  %s786_s0 = inlined_call_operand.vmem [shape: f32[16,128], index: 0, kind: input, shape index: {}]   ;;  %s787_s1 = inlined_call_operand.hbm [shape: bf16[128,128], index: 1, kind: input, shape index: {}]   ;;  %s788_s2 = inlined_call_operand.vmem [shape: f32[1,128], index: 2, kind: input, shape index: {}]   ;;  %s789_s3 = inlined_call_operand.hbm [shape: bf16[128,128], index: 3, kind: input, shape index: {}]   ;;  %s790_s4 = inlined_call_operand.vmem [shape: f32[1,128], index: 4, kind: input, shape index: {}]   ;;  %s791_s5 = inlined_call_operand.hbm [shape: bf16[128,128], index: 5, kind: input, shape index: {}]   ;;  %s792_s6 = inlined_call_operand.vmem [shape: f32[1,128], index: 6, kind: input, shape index: {}]   ;;  %s793_s7 = inlined_call_operand.vmem [shape: f32[16,128], index: 7, kind: output, shape index: {}]  }
   0x1   :  { %13 = vsyncpa [#allocation5], 0  ;;  %s636_s24 = smov [#allocation4]   ;;  %s637_s26 = smov [#allocation2]  }
   0x2   :  { %s35_s25 = sshll.u32 %s636_s24, 4  ;;  %s21_s27 = sshll.u32 %s637_s26, 4  ;;  %s36_s25 = int_to_ptr.vmem [resolvable:$true] %s35_s25  ;;  %s683_s27 = int_to_ptr.vmem [resolvable:$true] %s21_s27 }
   0x3   :  { %s566_s30 = scalar_lea.hbm %s789_s3, 1024 }
   0x4   :  { %p567_p0 = scmp.ne.s32.totalorder %s789_s3, %s566_s30  ;;  %p570_p1 = scmp.lt.u32.totalorder %s566_s30, %s789_s3 }
   0x6   :  { %p572_p2 = pnand %p570_p1, %p567_p0 }
   0x8   :  { %575 = shalt.err (!%p572_p2)
}
   0x9   :  { %s576_s12 = scalar_lea.vmem %s36_s25, 1024  ;;  %p581_p4 = scmp.lt.s32.totalorder %s36_s25, %s36_s25 }
   0xa   :  { %p577_p3 = scmp.ne.s32.totalorder %s36_s25, %s576_s12  ;;  %p582_p5 = scmp.lt.s32.totalorder %s576_s12, %s576_s12 }
   0xc   :  { %p583_p6 = por %p582_p5, %p581_p4 }
   0xe   :  { %p584_p7 = pnand %p583_p6, %p577_p3 }
  0x10   :  { %587 = shalt.err (!%p584_p7)
}
  0x11   :  { %s638_s13 = smov 64   ;;  %s639_s14 = smov 4  }
  0x12   :  { %41 = dma.hbm_to_vmem [thread:$0]  %s789_s3, 1024, %s36_s25, [#allocation5], %s638_s13, %s638_s13, %s639_s14  }
  0x13   :  { %s588_s19 = scalar_lea.hbm %s787_s1, 1024 }
  0x14   :  { %p589_p8 = scmp.ne.s32.totalorder %s787_s1, %s588_s19  ;;  %p592_p9 = scmp.lt.u32.totalorder %s588_s19, %s787_s1 }
  0x16   :  { %p594_p10 = pnand %p592_p9, %p589_p8 }
  0x18   :  { %597 = shalt.err (!%p594_p10)
}
  0x19   :  { %s598_s24 = scalar_lea.vmem %s683_s27, 1024  ;;  %p603_p12 = scmp.lt.s32.totalorder %s683_s27, %s683_s27 }
  0x1a   :  { %p599_p11 = scmp.ne.s32.totalorder %s683_s27, %s598_s24  ;;  %p604_p13 = scmp.lt.s32.totalorder %s598_s24, %s598_s24 }
  0x1c   :  { %p605_p0 = por %p604_p13, %p603_p12 }
  0x1e   :  { %p606_p1 = pnand %p605_p0, %p599_p11 }
  0x20   :  { %609 = shalt.err (!%p606_p1)
}
  0x21   :  { %27 = dma.hbm_to_vmem [thread:$0]  %s787_s1, 1024, %s683_s27, [#allocation3], %s638_s13, %s638_s13, %s639_s14  }
  0x22   :  { %s640_s26 = smov [#allocation6]   ;;  %s610_s8 = scalar_lea.hbm %s791_s5, 1024 }
  0x23   :  { %s49_s28 = sshll.u32 %s640_s26, 4  ;;  %p611_p2 = scmp.ne.s32.totalorder %s791_s5, %s610_s8  ;;  %s50_s28 = int_to_ptr.vmem [resolvable:$true] %s49_s28 }
  0x24   :  { %p614_p3 = scmp.lt.u32.totalorder %s610_s8, %s791_s5 }
  0x26   :  { %p616_p4 = pnand %p614_p3, %p611_p2 }
  0x28   :  { %619 = shalt.err (!%p616_p4)
}
  0x29   :  { %s620_s15 = scalar_lea.vmem %s50_s28, 1024  ;;  %p625_p6 = scmp.lt.s32.totalorder %s50_s28, %s50_s28 }
  0x2a   :  { %p621_p5 = scmp.ne.s32.totalorder %s50_s28, %s620_s15  ;;  %p626_p7 = scmp.lt.s32.totalorder %s620_s15, %s620_s15 }
  0x2c   :  { %p627_p8 = por %p626_p7, %p625_p6 }
  0x2e   :  { %p628_p9 = pnand %p627_p8, %p621_p5 }
  0x30   :  { %631 = shalt.err (!%p628_p9)
}
  0x31   :  { %55 = dma.hbm_to_vmem [thread:$0]  %s791_s5, 1024, %s50_s28, [#allocation5], %s638_s13, %s638_s13, %s639_s14  }
  0x32   :  { %632 = dma.done.wait [#allocation3], 1024  }
  0x33   :  { %633 = vsyncadd [#allocation3], 4294966272 }
  0x34   :  { %634 = dma.done.wait [#allocation5], 2048  }
  0x35   :  { %635 = vsyncadd [#allocation5], 4294965248  ;;  %v641_v0 = vmov 0.0   ;;  %vm642_vm0 = vmmov 0   ;;  %v542_v1 = vld [vmem:[#allocation2] sm:$0xff]   ;;  %v543_v2 = vld [vmem:[#allocation2 + $0x8] sm:$0xff]  }
  0x36   :  { %475 = vmatprep.subr.bf16.mxu0 %v641_v0  ;;  %491 = vmatprep.mubr.msk.bf16.mxu0 %vm642_vm0, %v641_v0  ;;  %v544_v3 = vld [vmem:[#allocation2 + $0x10] sm:$0xff]   ;;  %v550_v4 = vld [vmem:[#allocation4] sm:$0xff]   ;;  %v545_v5 = vld [vmem:[#allocation2 + $0x18] sm:$0xff]  }
  0x37   :  { %495 = vmatprep.subr.bf16.mxu1 %v641_v0  ;;  %511 = vmatprep.mubr.msk.bf16.mxu1 %vm642_vm0, %v641_v0  ;;  %v551_v6 = vld [vmem:[#allocation4 + $0x8] sm:$0xff]   ;;  %v546_v7 = vld [vmem:[#allocation2 + $0x20] sm:$0xff]   ;;  %v552_v8 = vld [vmem:[#allocation4 + $0x10] sm:$0xff]  }
  0x38   :  { %476 = vmatpush3.bf16.msra.mxu0 %v542_v1  ;;  %496 = vmatpush3.bf16.msra.mxu1 %v550_v4  ;;  %v547_v9 = vld [vmem:[#allocation2 + $0x28] sm:$0xff]   ;;  %v553_v10 = vld [vmem:[#allocation4 + $0x18] sm:$0xff]   ;;  %v548_v11 = vld [vmem:[#allocation2 + $0x30] sm:$0xff]  }
  0x39   :  { %477 = vmatprep.subr.bf16.mxu0 %v641_v0  ;;  %497 = vmatprep.subr.bf16.mxu1 %v641_v0  ;;  %v554_v12 = vld [vmem:[#allocation4 + $0x20] sm:$0xff]   ;;  %v549_v13 = vld [vmem:[#allocation2 + $0x38] sm:$0xff]   ;;  %v69_v15 = vld [vmem:[%s786_s0 + $0x8] sm:$0xff] }
  0x3a   :  { %v68_v14 = vld [vmem:[%s786_s0] sm:$0xff]  ;;  %v555_v16 = vld [vmem:[#allocation4 + $0x28] sm:$0xff]   ;;  %v556_v18 = vld [vmem:[#allocation4 + $0x30] sm:$0xff]  }
  0x3b   :  { %v70_v17 = vpack.c.bf16 %v69_v15, %v68_v14  ;;  %v557_v19 = vld [vmem:[#allocation4 + $0x38] sm:$0xff]   ;;  %v558_v20 = vld [vmem:[#allocation6] sm:$0xff]   ;;  %v559_v21 = vld [vmem:[#allocation6 + $0x8] sm:$0xff]  }
  0x3c   :  { %478 = vmatpush3.bf16.msra.mxu0 %v543_v2  ;;  %498 = vmatpush3.bf16.msra.mxu1 %v551_v6  ;;  %v560_v22 = vld [vmem:[#allocation6 + $0x10] sm:$0xff]   ;;  %v561_v23 = vld [vmem:[#allocation6 + $0x18] sm:$0xff]   ;;  %v562_v24 = vld [vmem:[#allocation6 + $0x20] sm:$0xff]  }
  0x3d   :  { %479 = vmatprep.subr.bf16.mxu0 %v641_v0  ;;  %499 = vmatprep.subr.bf16.mxu1 %v641_v0  ;;  %v563_v25 = vld [vmem:[#allocation6 + $0x28] sm:$0xff]   ;;  %v421_v26 = vld [vmem:[%s788_s2] ss:$0 sm:$0xff]  ;;  %v564_v36 = vld [vmem:[#allocation6 + $0x30] sm:$0xff]  }
  0x3e   :  { %v565_v37 = vld [vmem:[#allocation6 + $0x38] sm:$0xff]   ;;  %v430_v38 = vld [vmem:[%s790_s4] ss:$0 sm:$0xff] }
  0x3f   :  { %v439_v48 = vld [vmem:[%s792_s6] ss:$0 sm:$0xff] }
  0x40   :  { %480 = vmatpush3.bf16.msra.mxu0 %v544_v3  ;;  %500 = vmatpush3.bf16.msra.mxu1 %v552_v8 }
  0x41   :  { %481 = vmatprep.subr.bf16.mxu0 %v641_v0  ;;  %501 = vmatprep.subr.bf16.mxu1 %v641_v0 }
  0x44   :  { %482 = vmatpush3.bf16.msra.mxu0 %v545_v5  ;;  %502 = vmatpush3.bf16.msra.mxu1 %v553_v10 }
  0x45   :  { %483 = vmatprep.subr.bf16.mxu0 %v641_v0  ;;  %503 = vmatprep.subr.bf16.mxu1 %v641_v0 }
  0x48   :  { %484 = vmatpush3.bf16.msra.mxu0 %v546_v7  ;;  %504 = vmatpush3.bf16.msra.mxu1 %v554_v12 }
  0x49   :  { %485 = vmatprep.subr.bf16.mxu0 %v641_v0  ;;  %505 = vmatprep.subr.bf16.mxu1 %v641_v0 }
  0x4c   :  { %486 = vmatpush3.bf16.msra.mxu0 %v547_v9  ;;  %506 = vmatpush3.bf16.msra.mxu1 %v555_v16 }
  0x4d   :  { %487 = vmatprep.subr.bf16.mxu0 %v641_v0  ;;  %507 = vmatprep.subr.bf16.mxu1 %v641_v0 }
  0x50   :  { %488 = vmatpush3.bf16.msra.mxu0 %v548_v11  ;;  %508 = vmatpush3.bf16.msra.mxu1 %v556_v18 }
  0x51   :  { %489 = vmatprep.subr.bf16.mxu0 %v641_v0  ;;  %509 = vmatprep.subr.bf16.mxu1 %v641_v0 }
  0x54   :  { %490 = vmatpush3.bf16.msra.mxu0 %v549_v13  ;;  %510 = vmatpush3.bf16.msra.mxu1 %v557_v19 }
  0x55   :  { %515 = vmatprep.subr.bf16.mxu0 %v641_v0 }
  0x57   :  { %492 = vmatmul.mubr.bf16.vlgmr.msra.gmra.mrb[0].mxu0 %v70_v17 }
  0x58   :  { %531 = vmatprep.mubr.msk.bf16.mxu0 %vm642_vm0, %v641_v0  ;;  %516 = vmatpush3.bf16.msra.mxu0 %v558_v20 }
  0x59   :  { %517 = vmatprep.subr.bf16.mxu0 %v641_v0 }
  0x5c   :  { %518 = vmatpush3.bf16.msra.mxu0 %v559_v21 }
  0x5d   :  { %519 = vmatprep.subr.bf16.mxu0 %v641_v0 }
  0x60   :  { %520 = vmatpush3.bf16.msra.mxu0 %v560_v22 }
  0x61   :  { %521 = vmatprep.subr.bf16.mxu0 %v641_v0 }
  0x64   :  { %522 = vmatpush3.bf16.msra.mxu0 %v561_v23 }
  0x65   :  { %523 = vmatprep.subr.bf16.mxu0 %v641_v0 }
  0x68   :  { %524 = vmatpush3.bf16.msra.mxu0 %v562_v24 }
  0x69   :  { %525 = vmatprep.subr.bf16.mxu0 %v641_v0 }
  0x6c   :  { %526 = vmatpush3.bf16.msra.mxu0 %v563_v25 }
  0x6d   :  { %527 = vmatprep.subr.bf16.mxu0 %v641_v0 }
  0x70   :  { %528 = vmatpush3.bf16.msra.mxu0 %v564_v36 }
  0x71   :  { %529 = vmatprep.subr.bf16.mxu0 %v641_v0 }
  0x74   :  { %530 = vmatpush3.bf16.msra.mxu0 %v565_v37 }
 0x12a   :  { %v176_v27 = vpop.f32.mrb[0].mxu0 }
 0x12b   :  { %v177_v28 = vadd.f32 %v421_v26, %v176_v27  ;;  %v493_v29 = vpop.f32.mrb[1].mxu0 }
 0x12c   :  { %v179_v30 = vpop.f32.mrb[2].mxu0 }
 0x12d   :  { %v180_v31 = vadd.f32 %v421_v26, %v179_v30  ;;  %v494_v32 = vpop.f32.mrb[3].mxu0  ;;  %v183_v33 = vmax.f32 %v177_v28, 0.0 }
 0x12f   :  { %v184_v34 = vmax.f32 %v180_v31, 0.0 }
 0x131   :  { %v185_v35 = vpack.c.bf16 %v184_v34, %v183_v33 }
 0x133   :  { %512 = vmatmul.mubr.bf16.vlgmr.msra.gmra.mrb[0].mxu1 %v185_v35 }
 0x206   :  { %v291_v39 = vpop.f32.mrb[0].mxu1 }
 0x207   :  { %v292_v40 = vadd.f32 %v430_v38, %v291_v39  ;;  %v513_v41 = vpop.f32.mrb[1].mxu1 }
 0x208   :  { %v294_v42 = vpop.f32.mrb[2].mxu1 }
 0x209   :  { %v295_v43 = vadd.f32 %v430_v38, %v294_v42  ;;  %v514_v44 = vpop.f32.mrb[3].mxu1  ;;  %v298_v45 = vmax.f32 %v292_v40, 0.0 }
 0x20b   :  { %v299_v46 = vmax.f32 %v295_v43, 0.0 }
 0x20d   :  { %v300_v47 = vpack.c.bf16 %v299_v46, %v298_v45 }
 0x20f   :  { %532 = vmatmul.mubr.bf16.vlgmr.msra.gmra.mrb[4].mxu0 %v300_v47 }
 0x2e2   :  { %v406_v49 = vpop.f32.mrb[4].mxu0 }
 0x2e3   :  { %v407_v50 = vadd.f32 %v439_v48, %v406_v49  ;;  %v533_v51 = vpop.f32.mrb[5].mxu0 }
 0x2e4   :  { %v409_v52 = vpop.f32.mrb[6].mxu0 }
 0x2e5   :  { %413 = vst [vmem:[%s793_s7] sm:$0xff] %v407_v50  ;;  %v410_v53 = vadd.f32 %v439_v48, %v409_v52  ;;  %v534_v54 = vpop.f32.mrb[7].mxu0 }
 0x2e7   :  { %414 = vst [vmem:[%s793_s7 + $0x8] sm:$0xff] %v410_v53 }
 0x2e8   :  { %419 = vsyncpa [#allocation3], 1 }
 0x2e9   :  { %420 = vsyncpa [#allocation5], 1 }

</bundles_post_ra>
